<compile_context>
chip_gen: v7x
topology: tpu7x:2x2x1
jax: 0.10.0
libtpu: 0.0.40
codegen_flags: <defaults>
</compile_context>

<pallas_src>
import functools

import jax
import jax.numpy as jnp
from jax.experimental import pallas as pl
from jax.experimental.pallas import tpu as pltpu


def _gated_attn_kernel(x_ref, wab_ref, bab_ref, wc_ref, bc_ref, At_ref, *, D):
    # Fused projection: one MXU matmul for both attention_a and attention_b.
    x = x_ref[...]                                    # [t, L] (f32 or bf16)
    xw = jnp.dot(x, wab_ref[...],
                 preferred_element_type=jnp.float32) + bab_ref[...]   # [t, 2D] f32

    a = jnp.tanh(xw[:, :D])                           # attention_a (EUP)
    b = jax.nn.sigmoid(xw[:, D:])                     # attention_b (EUP)
    gated = a * b                                     # [t, D] f32 (VPU)

    # attention_c emitted transposed: A^T[c, n] = sum_d Wc^T[c, d] * gated[n, d]
    # (contract on the last dim of both -> tokens stay on lanes -> lane-dense store).
    At = jax.lax.dot_general(
        wc_ref[...], gated,
        dimension_numbers=(((1,), (1,)), ((), ())),
        preferred_element_type=jnp.float32) + bc_ref[...]              # [C_pad, t]

    At_ref[...] = At.astype(At_ref.dtype)


def _pick_row_tile(N, L, D, itemsize, budget_bytes=28 * 1024 * 1024):
    """Largest 128-multiple row tile whose streamed x block + f32 intermediates
    fit a conservative VMEM budget (valid for v5e/v6e and v7x's 64 MiB VMEM)."""
    # 2x-buffered x tile + f32 intermediates (xw [t,2D]; a/b/gated ~3*[t,D]).
    per_row = 2 * L * itemsize + 4 * (2 * D + 3 * D)
    t = budget_bytes // max(per_row, 1)
    return int(max(128, min(2048, (t // 128) * 128)))


def attn_net_gated(x, wa, ba, wb, bb, wc, bc, *,
                   row_tile=None, vmem_limit_bytes=48 * 1024 * 1024):
    """Fused gated-attention forward. Returns (A, x) like the PyTorch module.

    A is always float32 (attention logits feed a downstream softmax)."""
    N, L = x.shape
    D = wa.shape[1]
    C = wc.shape[1]

    # ---- wrapper-side weight prep (tiny, done once) ----
    # Fuse Wa|Wb -> [L, 2D] and ba|bb -> [1, 2D] so the kernel does one x-projection.
    wab = jnp.concatenate([wa, wb], axis=1).astype(x.dtype)                  # [L, 2D]
    bab = jnp.concatenate([ba, bb], axis=0).reshape(1, 2 * D).astype(jnp.float32)
    # Final projection kept feature-on-lanes: Wc as [C_pad, D], bias as [C_pad, 1].
    # Pad n_classes up to a sublane multiple so the MXU / store tiles are aligned.
    C_pad = max(8, ((C + 7) // 8) * 8)
    wc_cd = jnp.pad(jnp.transpose(wc).astype(jnp.float32), ((0, C_pad - C), (0, 0)))
    bc_col = jnp.pad(bc.reshape(C, 1).astype(jnp.float32), ((0, C_pad - C), (0, 0)))

    # ---- tile selection (no divisibility requirement on N) ----
    if row_tile is None:
        if N <= 1024:
            row_tile = N                       # single block covers the whole bag
        else:
            row_tile = _pick_row_tile(N, L, D, jnp.dtype(x.dtype).itemsize)
            # Keep >= 2 grid steps so both v7x TensorCores get work.
            half = ((((N + 1) // 2) + 127) // 128) * 128
            row_tile = min(row_tile, max(128, half))
    if row_tile != N:
        assert row_tile % 128 == 0, "row_tile must be a multiple of 128 (or == N)"

    grid = (pl.cdiv(N, row_tile),)
    kernel = functools.partial(_gated_attn_kernel, D=D)

    A_t = pl.pallas_call(
        kernel,
        out_shape=jax.ShapeDtypeStruct((C_pad, N), jnp.float32),
        grid_spec=pltpu.PrefetchScalarGridSpec(
            num_scalar_prefetch=0,
            grid=grid,
            in_specs=[
                pl.BlockSpec((row_tile, L), lambda i: (i, 0)),   # x rows (streamed)
                pl.BlockSpec((L, 2 * D), lambda i: (0, 0)),      # fused Wa|Wb (resident)
                pl.BlockSpec((1, 2 * D), lambda i: (0, 0)),      # fused ba|bb
                pl.BlockSpec((C_pad, D), lambda i: (0, 0)),      # Wc^T (padded)
                pl.BlockSpec((C_pad, 1), lambda i: (0, 0)),      # bc column (padded)
            ],
            out_specs=pl.BlockSpec((C_pad, row_tile), lambda i: (0, i)),
        ),
        compiler_params=pltpu.CompilerParams(
            dimension_semantics=("parallel",),
            vmem_limit_bytes=vmem_limit_bytes),
    )(x, wab, bab, wc_cd, bc_col)

    A = jnp.transpose(A_t[:C, :])    # back to [N, C], float32
    return A, x


def init_params(key, L, D, C, dtype=jnp.float32):
    """Deterministic synthetic parameters (PyTorch nn.Linear init, transposed)."""
    ks = jax.random.split(key, 6)
    scale_l = 1.0 / jnp.sqrt(L)
    scale_d = 1.0 / jnp.sqrt(D)
    wa = jax.random.uniform(ks[0], (L, D), dtype, -scale_l, scale_l)
    ba = jax.random.uniform(ks[1], (D,), dtype, -scale_l, scale_l)
    wb = jax.random.uniform(ks[2], (L, D), dtype, -scale_l, scale_l)
    bb = jax.random.uniform(ks[3], (D,), dtype, -scale_l, scale_l)
    wc = jax.random.uniform(ks[4], (D, C), dtype, -scale_d, scale_d)
    bc = jax.random.uniform(ks[5], (C,), dtype, -scale_d, scale_d)
    return wa, ba, wb, bb, wc, bc


def _reference(x, wa, ba, wb, bb, wc, bc):
    hi = jax.lax.Precision.HIGHEST
    a = jnp.tanh(jnp.dot(x, wa, precision=hi) + ba)
    b = jax.nn.sigmoid(jnp.dot(x, wb, precision=hi) + bb)
    return jnp.dot(a * b, wc, precision=hi) + bc


if __name__ == "__main__":
    # TODO(synk): nn.Dropout branch (dropout=True) not implemented; default module
    # config has dropout=False, which is what this forward pass covers.
    key = jax.random.PRNGKey(0)
    k1, k2, k3, k4 = jax.random.split(key, 4)

    # Case 1: ragged bag size (N not a multiple of the tile), multi-block grid,
    # n_classes = 1 (module default) -> exercises the lane-dense transposed output.
    N, L, D, C = 200, 256, 128, 1
    x = jax.random.normal(k1, (N, L), jnp.float32)
    params = init_params(k2, L, D, C)
    A, x_out = attn_net_gated(x, *params, row_tile=128)
    jax.block_until_ready((A, x_out))
    A_ref = _reference(x, *params)
    assert A.shape == (N, C) and A.dtype == jnp.float32
    assert x_out.shape == (N, L)
    assert jnp.allclose(A, A_ref, atol=1e-4, rtol=1e-4), float(jnp.max(jnp.abs(A - A_ref)))
    assert jnp.array_equal(x_out, x)

    # Case 2: n_classes > 1, single block (row_tile defaults to N).
    N2, L2, D2, C2 = 128, 256, 128, 4
    x2 = jax.random.normal(k3, (N2, L2), jnp.float32)
    params2 = init_params(k4, L2, D2, C2)
    A2, x2_out = attn_net_gated(x2, *params2)
    jax.block_until_ready((A2, x2_out))
    A2_ref = _reference(x2, *params2)
    assert A2.shape == (N2, C2)
    assert jnp.allclose(A2, A2_ref, atol=1e-4, rtol=1e-4), float(jnp.max(jnp.abs(A2 - A2_ref)))
    assert jnp.array_equal(x2_out, x2)

    print("KERNEL_OK")
</pallas_src>

<mosaic_0001>
module attributes {stable_mosaic.version = 11 : i64} {
  func.func @_gated_attn_kernel(%arg0: i32, %arg1: memref<128x256xf32, #tpu.memory_space<vmem>>, %arg2: memref<256x256xf32, #tpu.memory_space<vmem>>, %arg3: memref<1x256xf32, #tpu.memory_space<vmem>>, %arg4: memref<8x128xf32, #tpu.memory_space<vmem>>, %arg5: memref<8x1xf32, #tpu.memory_space<vmem>>, %arg6: memref<8x128xf32, #tpu.memory_space<vmem>>) attributes {dimension_semantics = [#tpu.dimension_semantics<parallel>], iteration_bounds = array<i64: 2>, scalar_prefetch = 0 : i64, scratch_operands = 0 : i64, tpu.core_type = #tpu.core_type<tc>, window_params = [{transform_indices = @transform_0, window_bounds = array<i64: 128, 256>}, {pipeline_mode = #tpu.pipeline_mode<synchronous>, transform_indices = @transform_1, window_bounds = array<i64: 256, 256>}, {pipeline_mode = #tpu.pipeline_mode<synchronous>, transform_indices = @transform_2, window_bounds = array<i64: 1, 256>}, {pipeline_mode = #tpu.pipeline_mode<synchronous>, transform_indices = @transform_3, window_bounds = array<i64: 8, 128>}, {pipeline_mode = #tpu.pipeline_mode<synchronous>, transform_indices = @transform_4, window_bounds = array<i64: 8, 1>}, {transform_indices = @transform_5, window_bounds = array<i64: 8, 128>}]} {
    %c0 = arith.constant 0 : index
    %c0_0 = arith.constant 0 : index
    %0 = vector.load %arg1[%c0, %c0_0] : memref<128x256xf32, #tpu.memory_space<vmem>>, vector<128x256xf32>
    %c0_1 = arith.constant 0 : index
    %c0_2 = arith.constant 0 : index
    %1 = vector.load %arg2[%c0_1, %c0_2] : memref<256x256xf32, #tpu.memory_space<vmem>>, vector<256x256xf32>
    %cst = arith.constant dense<0.000000e+00> : vector<128x256xf32>
    %2 = tpu.matmul %0, %1, %cst {dimension_numbers = #tpu.dot_dimension_numbers<[1], [0], [0], [1], [0, 0, 1, 1], [], []>} : vector<128x256xf32>, vector<256x256xf32>, vector<128x256xf32> -> vector<128x256xf32>
    %c0_3 = arith.constant 0 : index
    %c0_4 = arith.constant 0 : index
    %3 = vector.load %arg3[%c0_3, %c0_4] : memref<1x256xf32, #tpu.memory_space<vmem>>, vector<1x256xf32>
    %4 = vector.broadcast %3 : vector<1x256xf32> to vector<128x256xf32>
    %5 = arith.addf %2, %4 : vector<128x256xf32>
    %6 = vector.extract_strided_slice %5 {offsets = [0, 0], sizes = [128, 128], strides = [1, 1]} : vector<128x256xf32> to vector<128x128xf32>
    %7 = math.tanh %6 : vector<128x128xf32>
    %8 = vector.extract_strided_slice %5 {offsets = [0, 128], sizes = [128, 128], strides = [1, 1]} : vector<128x256xf32> to vector<128x128xf32>
    %9 = arith.negf %8 : vector<128x128xf32>
    %10 = math.exp %9 : vector<128x128xf32>
    %cst_5 = arith.constant 1.000000e+00 : f32
    %11 = vector.broadcast %cst_5 : f32 to vector<128x128xf32>
    %12 = arith.addf %11, %10 : vector<128x128xf32>
    %13 = arith.divf %11, %12 : vector<128x128xf32>
    %14 = arith.mulf %7, %13 : vector<128x128xf32>
    %c0_6 = arith.constant 0 : index
    %c0_7 = arith.constant 0 : index
    %15 = vector.load %arg4[%c0_6, %c0_7] : memref<8x128xf32, #tpu.memory_space<vmem>>, vector<8x128xf32>
    %cst_8 = arith.constant dense<0.000000e+00> : vector<8x128xf32>
    %16 = tpu.matmul %15, %14, %cst_8 {dimension_numbers = #tpu.dot_dimension_numbers<[1], [1], [0], [0], [0, 0, 1, 0], [], []>} : vector<8x128xf32>, vector<128x128xf32>, vector<8x128xf32> -> vector<8x128xf32>
    %c0_9 = arith.constant 0 : index
    %c0_10 = arith.constant 0 : index
    %17 = vector.load %arg5[%c0_9, %c0_10] : memref<8x1xf32, #tpu.memory_space<vmem>>, vector<8x1xf32>
    %18 = vector.broadcast %17 : vector<8x1xf32> to vector<8x128xf32>
    %19 = arith.addf %16, %18 : vector<8x128xf32>
    %c0_11 = arith.constant 0 : index
    %c0_12 = arith.constant 0 : index
    %20 = vector.load %arg6[%c0_11, %c0_12] : memref<8x128xf32, #tpu.memory_space<vmem>>, vector<8x128xf32>
    tpu.vector_store %arg6[%c0_11, %c0_12], %19 {strides = array<i32>} : memref<8x128xf32, #tpu.memory_space<vmem>>, vector<8x128xf32>,
    return
  }
  func.func @transform_0(%arg0: i32) -> (i32, i32) {
    %c0_i32 = arith.constant 0 : i32
    %c0_i32_0 = arith.constant 0 : i32
    return %arg0, %c0_i32 : i32, i32
  }
  func.func @transform_1(%arg0: i32) -> (i32, i32) {
    %c0_i32 = arith.constant 0 : i32
    %c0_i32_0 = arith.constant 0 : i32
    %c0_i32_1 = arith.constant 0 : i32
    return %c0_i32, %c0_i32_0 : i32, i32
  }
  func.func @transform_2(%arg0: i32) -> (i32, i32) {
    %c0_i32 = arith.constant 0 : i32
    %c0_i32_0 = arith.constant 0 : i32
    %c0_i32_1 = arith.constant 0 : i32
    return %c0_i32, %c0_i32_0 : i32, i32
  }
  func.func @transform_3(%arg0: i32) -> (i32, i32) {
    %c0_i32 = arith.constant 0 : i32
    %c0_i32_0 = arith.constant 0 : i32
    %c0_i32_1 = arith.constant 0 : i32
    return %c0_i32, %c0_i32_0 : i32, i32
  }
  func.func @transform_4(%arg0: i32) -> (i32, i32) {
    %c0_i32 = arith.constant 0 : i32
    %c0_i32_0 = arith.constant 0 : i32
    %c0_i32_1 = arith.constant 0 : i32
    return %c0_i32, %c0_i32_0 : i32, i32
  }
  func.func @transform_5(%arg0: i32) -> (i32, i32) {
    %c0_i32 = arith.constant 0 : i32
    %c0_i32_0 = arith.constant 0 : i32
    return %c0_i32, %arg0 : i32, i32
  }
}

</mosaic_0001>

<bundles_post_ra>
// kernel: tpu_custom_call.1
= control target key start
LH: loop header
LB: loop body
LE: loop exit
PB: predicated region body
PF: predicated region fallthrough
CT: control target
= control target key end

     0   :  { %10 = vsyncpa [#allocation3], 0  ;;  %s1632_s0 = inlined_call_operand.hbm [shape: f32[200,256], index: 0, kind: input, shape index: {}]   ;;  %s1633_s1 = inlined_call_operand.hbm [shape: f32[256,256], index: 1, kind: input, shape index: {}]   ;;  %s1634_s2 = inlined_call_operand.vmem [shape: f32[1,256], index: 2, kind: input, shape index: {}]   ;;  %s1635_s3 = inlined_call_operand.vmem [shape: f32[8,128], index: 3, kind: input, shape index: {}]   ;;  %s1636_s4 = inlined_call_operand.vmem [shape: f32[8,1], index: 4, kind: input, shape index: {}]   ;;  %s1637_s5 = inlined_call_operand.hbm [shape: f32[8,200], index: 5, kind: output, shape index: {}]  }
   0x1   :  { %12 = vsyncpa [#allocation3 + $0x1], 0 }
   0x2   :  { %13 = vsyncpa [#allocation6], 0 }
   0x3   :  { %14 = vsyncpa [#allocation4], 0 }
   0x4   :  { %16 = vsyncpa [#allocation4 + $0x1], 0  ;;  %s1346_s18 = smov 0   ;;  %s1348_s19 = smov 0  }
   0x5   :  { %s1350_s20 = smov 0   ;;  %s1352_s21 = smov 0  }
   0x6 LB: > { %s1367_s22 = sadd.s32 4294967295, %s1303_s21   ;;  %s841_s23 = sadd.s32 4294967294, %s1303_s21   ;;  %s1303_s21 = sphi %s1352_s21, %s1658_s21   ;;  %s1299_s20 = sphi %s1350_s20, %s1657_s20   ;;  %s1295_s19 = sphi %s1348_s19, %s1656_s19   ;;  %s1291_s18 = sphi %s1346_s18, %s1655_s18  }
   0x7   : > { %s1371_s24 = sadd.s32 1, %s1303_s21   ;;  %s29_s25 = sadd.s32 1, %s1299_s20 }
   0x8   : > { %s26_s26 = ssub.s32 %s1303_s21, %s1371_s24  ;;  %p36_p0 = scmp.ne.s32.totalorder %s1299_s20, %s1295_s19 }
   0x9   : > { %p27_p1 = scmp.eq.s32.totalorder %s26_s26, 0  ;;  %p37_p2 = scmp.eq.s32.totalorder %s1303_s21, 0 }
   0xa   : > { %p42_p3 = scmp.ne.s32.totalorder %s1295_s19, %s1291_s18  ;;  %p1638_p4 = scmp.eq.s32.totalorder %s1367_s22, 0 }
   0xb   : > { %s1383_s27 = scalar_select %p27_p1, %s1299_s20, %s29_s25  }
   0xc   : > { %p1385_p5 = por %p37_p2, %p36_p0  ;;  %p1391_p6 = por %p1638_p4, %p42_p3 }
   0xd   : > { %p150_p7 = scmp.eq.s32.totalorder %s1367_s22, 1  ;;  %p156_p8 = scmp.eq.s32.totalorder %s841_s23, 1 }
   0xe   : > { %s1642_s28 = scalar_select %p1385_p5, 1, 0 }
   0xf   : > { %s1643_s29 = scalar_select %p1391_p6, 1, 0 }
  0x10   : > { %p842_p9 = scmp.ge.s32.totalorder %s1303_s21, 1  ;;  %p163_p10 = scmp.lt.s32.totalorder %s1303_s21, 3 }
  0x11   : > { %p1398_p11 = por %p150_p7, %p36_p0  ;;  %p1402_p12 = por %p156_p8, %p42_p3 }
  0x12   : > { %p1406_p13 = pnand %p842_p9, %p163_p10  ;;  %s1305_s8 = smov [#allocation5]  }
  0x13   : > { %s1644_s30 = scalar_select %p1398_p11, 1, 0 }
  0x14   : > { %s1645_s6 = scalar_select %p1402_p12, 1, 0 }
  0x15   : > { %s1646_s7 = scalar_select %p1406_p13, 1, 0 }
  0x16   : > { %p1028_p1 = pneg %p1406_p13  ;;  %s175_s9 = sshll.u32 %s1305_s8, 4  ;;  %s176_s9 = int_to_ptr.vmem [resolvable:$true] %s175_s9 }
  0x17   : > { %s1177_s13 = scalar_lea.hbm %s1633_s1, 8192 }
  0x18   : > { %p1414_p2 = pnand %p1028_p1, %p1638_p4  ;;  %p1178_p0 = scmp.ne.s32.totalorder %s1633_s1, %s1177_s13 }
  0x19   : > { %p1184_p9 = scmp.lt.u32.totalorder %s1177_s13, %s1633_s1 }
  0x1a   : > { %p1179_p3 = pneg %p1414_p2 }
  0x1c   : > { %p1180_p7 = pnand %p1179_p3, %p1178_p0 }
  0x1e   : > { %p1181_p8 = pneg %p1180_p7 }
  0x20   : > { %p1186_p10 = pnand %p1184_p9, %p1181_p8 }
  0x22   : > { %1189 = shalt.err (!%p1186_p10)
}
  0x23   : > { %s1190_s23 = scalar_lea.vmem %s176_s9, 8192  ;;  %p1198_p11 = scmp.lt.s32.totalorder %s176_s9, %s176_s9 }
  0x24   : > { %p1191_p1 = scmp.ne.s32.totalorder %s176_s9, %s1190_s23  ;;  %p1199_p6 = scmp.lt.s32.totalorder %s1190_s23, %s1190_s23 }
  0x26   : > { %p1193_p4 = pnand %p1191_p1, %p1179_p3  ;;  %p1200_p13 = por %p1199_p6, %p1198_p11 }
  0x28   : > { %p1194_p12 = pneg %p1193_p4 }
  0x2a   : > { %p1201_p5 = pnand %p1200_p13, %p1194_p12 }
  0x2c   : > { %1204 = shalt.err (!%p1201_p5)
}
  0x2d   : > { %s1306_s25 = smov 256   ;;  %s1307_s26 = smov 16  }
  0x2e   : > { %1031 = dma.hbm_to_vmem [thread:$0]  (!%p1414_p2), %s1633_s1, 8192, %s176_s9, [#allocation6], %s1306_s25, %s1306_s25, %s1307_s26  }
  0x2f   : > { %p844_p0 = scmp.ge.s32.totalorder %s1303_s21, 2 }
  0x30   : > { %p1648_p4 = scmp.ne.s32.totalorder (!%p844_p0), %s1642_s28, 0 }
  0x31   : > { %194 = sbr.rel (%p844_p0) target bundleno = 91 (0x5b), region = 32 }
  0x38   : > { %197 = sbr.rel (!%p1648_p4) target bundleno = 91 (0x5b), region = 36  ;;  %s198_s12 = sand.u32 (%p1648_p4), 1, %s1299_s20  }
  0x39   : > { %s846_s13 = sshll.u32 (%p1648_p4), %s1303_s21, 4  ;;  %s845_s14 = sshll.u32 (%p1648_p4), %s198_s12, 8 }
  0x3a   : > { %s204_s15 = ssub.s32 (%p1648_p4), 25, %s846_s13  ;;  %s1444_s16 = scalar_lea.sflag (%p1648_p4), [#allocation3], %s198_s12 }
  0x3b   : > { %p205_p5 = scmp.lt.s32.totalorder (%p1648_p4), %s204_s15, 16  ;;  %s202_s17 = scalar_lea.vmem (%p1648_p4), [#allocation2], %s845_s14 }
  0x3f   : > { %s1660_s15 = smov (!%p205_p5, %s204_s15), 16 }
  0x40   : > { %s1441_s10 = sshll.u32 %s1660_s15, 8 }
  0x41   : > { %s210_s9 = ssub.s32 4096, %s1441_s10 }
  0x42   : > { %211 = vsyncadd %s1444_s16, %s210_s9  ;;  %p849_p6 = scmp.ne.s32.totalorder %s1441_s10, 0  ;;  %s880_s28 = sshll.u32 %s1303_s21, 12 }
  0x43   : > { %s1452_s26 = scalar_lea.hbm %s1632_s0, %s880_s28  ;;  %s217_s8 = sshll.u32 %s202_s17, 4  ;;  %s1454_s8 = int_to_ptr.vmem [resolvable:$true] %s217_s8 }
  0x44   : > { %s1205_s11 = scalar_lea.hbm %s1452_s26, %s1441_s10  ;;  %s1209_s14 = scalar_lea.hbm %s1632_s0, 6400 }
  0x45   : > { %p1206_p11 = scmp.ne.s32.totalorder %s1452_s26, %s1205_s11  ;;  %p1210_p2 = scmp.lt.u32.totalorder %s1452_s26, %s1632_s0 }
  0x46   : > { %p1211_p3 = scmp.lt.u32.totalorder %s1209_s14, %s1205_s11  ;;  %p1213_p8 = scmp.lt.u32.totalorder %s1205_s11, %s1452_s26 }
  0x47   : > { %p1207_p12 = pnand %p1206_p11, %p849_p6 }
  0x48   : > { %p1212_p7 = por %p1211_p3, %p1210_p2 }
  0x49   : > { %p1208_p13 = pneg %p1207_p12 }
  0x4a   : > { %p1214_p9 = por %p1213_p8, %p1212_p7 }
  0x4c   : > { %p1215_p10 = pnand %p1214_p9, %p1208_p13 }
  0x4e   : > { %1218 = shalt.err (!%p1215_p10)
}
  0x4f   : > { %s1219_s17 = scalar_lea.vmem %s1454_s8, %s1441_s10  ;;  %s1308_s28 = smov [#allocation2]  }
  0x50   : > { %p1220_p1 = scmp.ne.s32.totalorder %s1454_s8, %s1219_s17  ;;  %s1223_s23 = sshll.u32 %s1308_s28, 4  ;;  %s1224_s23 = int_to_ptr.vmem [resolvable:$false] %s1223_s23 }
  0x51   : > { %s1225_s25 = scalar_lea.vmem %s1224_s23, 8192  ;;  %p1226_p11 = scmp.lt.s32.totalorder %s1454_s8, %s1224_s23 }
  0x52   : > { %p1221_p4 = pnand %p1220_p1, %p849_p6  ;;  %p1227_p12 = scmp.lt.s32.totalorder %s1225_s25, %s1219_s17 }
  0x54   : > { %p1222_p5 = pneg %p1221_p4  ;;  %p1228_p2 = por %p1227_p12, %p1226_p11 }
  0x56   : > { %p1229_p3 = pnand %p1228_p2, %p1222_p5 }
  0x58   : > { %1232 = shalt.err (!%p1229_p3)
}
  0x59   : > { %s1309_s11 = smov 256   ;;  %s1310_s12 = smov 16  }
  0x5a   : > { %223 = dma.hbm_to_vmem [thread:$0]  (%p849_p6), %s1452_s26, %s1441_s10, %s1454_s8, %s1444_s16, %s1309_s11, %s1309_s11, %s1310_s12  }
  0x5b PF: > { %p1649_p13 = scmp.ne.s32.totalorder %s1646_s7, 0 }
  0x5c   : > { %s1484_s13 = sand.u32 (!%p1649_p13), 1, %s1295_s19   ;;  %p1650_p7 = scmp.ne.s32.totalorder (!%p1649_p13), %s1643_s29, 0 }
  0x5d   : > { %229 = sbr.rel (%p1649_p13) target bundleno = 711 (0x2c7), region = 40  ;;  %s855_s14 = sshll.u32 (!%p1649_p13), %s1484_s13, 8 }
  0x5e   : > { %s232_s15 = scalar_lea.sflag (!%p1649_p13), [#allocation3], %s1484_s13  ;;  %s1488_s9 = scalar_lea.vmem (!%p1649_p13), [#allocation2], %s855_s14 }
  0x64   : > { %1278 = dma.done.wait (%p1650_p7), %s232_s15, 4096  }
  0x65   : > { %1280 = vsyncadd (%p1650_p7), %s232_s15, 4294963200  ;;  %p1651_p6 = scmp.eq.s32.totalorder %s1367_s22, 0 }
  0x67   : > { %1282 = dma.done.wait (%p1651_p6), [#allocation6], 8192   ;;  %p1652_p8 = pmov %p1651_p6 }
  0x68   : > { %v305_v0 = vld [vmem:[#allocation5 + $0x8] sm:$0xff]  ;;  %v307_v1 = vld [vmem:[#allocation5 + $0x18] sm:$0xff]  ;;  %v304_v2 = vld [vmem:[#allocation5] sm:$0xff]  ;;  %vm1312_vm0 = vmmov 0   ;;  %s857_s17 = sshll.u32 %s1484_s13, 3  ;;  %s875_s28 = sshll.u32 %s1367_s22, 7 }
  0x69   : > { %1284 = vsyncadd (%p1652_p8), [#allocation6], 4294959104  ;;  %v933_v3 = vpack.c.bf16 %v307_v1, %v305_v0  ;;  %v306_v4 = vld [vmem:[#allocation5 + $0x10] sm:$0xff]  ;;  %v309_v5 = vld [vmem:[#allocation5 + $0x28] sm:$0xff]  ;;  %s265_s23 = scalar_lea.vmem [#allocation7], %s857_s17  ;;  %s1588_s14 = scalar_lea.hbm %s1637_s5, %s875_s28 }
  0x6a   : > { %v311_v6 = vld [vmem:[#allocation5 + $0x38] sm:$0xff]  ;;  %v935_v7 = vpack.c.bf16 %v306_v4, %v304_v2  ;;  %v308_v9 = vld [vmem:[#allocation5 + $0x20] sm:$0xff]  ;;  %v310_v10 = vld [vmem:[#allocation5 + $0x30] sm:$0xff]  ;;  %s761_s25 = sshll.u32 %s265_s23, 4  ;;  %s748_s15 = scalar_lea.sflag [#allocation4], %s1484_s13  ;;  %s1590_s25 = int_to_ptr.vmem [resolvable:$true] %s761_s25 }
  0x6b   : > { %v937_v8 = vpack.c.bf16 %v311_v6, %v309_v5  ;;  %v313_v11 = vld [vmem:[#allocation5 + $0x48] sm:$0xff]  ;;  %934 = vmatprep.subr.bf16.mxu0 %v933_v3  ;;  %v315_v12 = vld [vmem:[#allocation5 + $0x58] sm:$0xff]  ;;  %v939_v13 = vpack.c.bf16 %v310_v10, %v308_v9  ;;  %v312_v15 = vld [vmem:[#allocation5 + $0x40] sm:$0xff]  ;;  %p1653_p10 = scmp.ne.s32.totalorder %s1644_s30, 0  ;;  %s1315_s22 = smov [#allocation7]  }
  0x6c   : > { %936 = vmatpush1.bf16.msra.mxu0 %v935_v7  ;;  %v941_v14 = vpack.c.bf16 %v315_v12, %v313_v11  ;;  %v314_v16 = vld [vmem:[#allocation5 + $0x50] sm:$0xff]  ;;  %v317_v17 = vld [vmem:[#allocation5 + $0x68] sm:$0xff]  ;;  %v319_v18 = vld [vmem:[#allocation5 + $0x78] sm:$0xff]  ;;  %s1237_s29 = sshll.u32 %s1315_s22, 4  ;;  %s1238_s29 = int_to_ptr.vmem [resolvable:$false] %s1237_s29 }
  0x6d   : > { %938 = vmatprep.subr.bf16.mxu0 %v937_v8  ;;  %v943_v19 = vpack.c.bf16 %v314_v16, %v312_v15  ;;  %v945_v20 = vpack.c.bf16 %v319_v18, %v317_v17  ;;  %v316_v21 = vld [vmem:[#allocation5 + $0x60] sm:$0xff]  ;;  %v318_v22 = vld [vmem:[#allocation5 + $0x70] sm:$0xff]  ;;  %v321_v23 = vld [vmem:[#allocation5 + $0x88] sm:$0xff]  ;;  %s1239_s7 = scalar_lea.vmem %s1238_s29, 256  ;;  %p1240_p5 = scmp.lt.s32.totalorder %s1590_s25, %s1238_s29 }
  0x6e   : > { %v323_v24 = vld [vmem:[#allocation5 + $0x98] sm:$0xff]  ;;  %v947_v25 = vpack.c.bf16 %v318_v22, %v316_v21  ;;  %v320_v27 = vld [vmem:[#allocation5 + $0x80] sm:$0xff]  ;;  %v322_v28 = vld [vmem:[#allocation5 + $0x90] sm:$0xff] }
  0x6f   : > { %v949_v26 = vpack.c.bf16 %v323_v24, %v321_v23  ;;  %v325_v29 = vld [vmem:[#allocation5 + $0xa8] sm:$0xff]  ;;  %v327_v30 = vld [vmem:[#allocation5 + $0xb8] sm:$0xff]  ;;  %v951_v31 = vpack.c.bf16 %v322_v28, %v320_v27  ;;  %v324_v33 = vld [vmem:[#allocation5 + $0xa0] sm:$0xff] }
  0x70   : > { %940 = vmatpush1.bf16.msra.mxu0 %v939_v13  ;;  %v953_v32 = vpack.c.bf16 %v327_v30, %v325_v29  ;;  %v326_v34 = vld [vmem:[#allocation5 + $0xb0] sm:$0xff]  ;;  %v329_v35 = vld [vmem:[#allocation5 + $0xc8] sm:$0xff]  ;;  %v331_v36 = vld [vmem:[#allocation5 + $0xd8] sm:$0xff] }
  0x71   : > { %942 = vmatprep.subr.bf16.mxu0 %v941_v14  ;;  %v955_v37 = vpack.c.bf16 %v326_v34, %v324_v33  ;;  %v957_v38 = vpack.c.bf16 %v331_v36, %v329_v35  ;;  %v328_v39 = vld [vmem:[#allocation5 + $0xc0] sm:$0xff]  ;;  %v330_v40 = vld [vmem:[#allocation5 + $0xd0] sm:$0xff]  ;;  %v273_v41 = vld [vmem:[%s1488_s9 + $0x8] sm:$0xff] }
  0x72   : > { %v333_v42 = vld [vmem:[#allocation5 + $0xe8] sm:$0xff]  ;;  %v335_v43 = vld [vmem:[#allocation5 + $0xf8] sm:$0xff]  ;;  %444 = vmatprep.mubr.f32.mxu0 %v273_v41  ;;  %v959_v44 = vpack.c.bf16 %v330_v40, %v328_v39  ;;  %v332_v46 = vld [vmem:[#allocation5 + $0xe0] sm:$0xff] }
  0x73   : > { %v961_v45 = vpack.c.bf16 %v335_v43, %v333_v42  ;;  %v334_v47 = vld [vmem:[#allocation5 + $0xf0] sm:$0xff]  ;;  %v337_v48 = vld [vmem:[#allocation5 + $0x108] sm:$0xff]  ;;  %v339_v49 = vld [vmem:[#allocation5 + $0x118] sm:$0xff] }
  0x74   : > { %944 = vmatpush1.bf16.msra.mxu0 %v943_v19  ;;  %v963_v50 = vpack.c.bf16 %v334_v47, %v332_v46  ;;  %v965_v51 = vpack.c.bf16 %v339_v49, %v337_v48  ;;  %v336_v52 = vld [vmem:[#allocation5 + $0x100] sm:$0xff]  ;;  %v338_v53 = vld [vmem:[#allocation5 + $0x110] sm:$0xff]  ;;  %v341_v54 = vld [vmem:[#allocation5 + $0x128] sm:$0xff] }
  0x75   : > { %946 = vmatprep.subr.bf16.mxu0 %v945_v20  ;;  %v343_v55 = vld [vmem:[#allocation5 + $0x138] sm:$0xff]  ;;  %v967_v56 = vpack.c.bf16 %v338_v53, %v336_v52  ;;  %v340_v58 = vld [vmem:[#allocation5 + $0x120] sm:$0xff]  ;;  %v342_v59 = vld [vmem:[#allocation5 + $0x130] sm:$0xff] }
  0x76   : > { %v969_v57 = vpack.c.bf16 %v343_v55, %v341_v54  ;;  %v345_v60 = vld [vmem:[#allocation5 + $0x148] sm:$0xff]  ;;  %v347_v61 = vld [vmem:[#allocation5 + $0x158] sm:$0xff]  ;;  %v971_v62 = vpack.c.bf16 %v342_v59, %v340_v58  ;;  %v344_v0 = vld [vmem:[#allocation5 + $0x140] sm:$0xff] }
  0x77   : > { %v973_v63 = vpack.c.bf16 %v347_v61, %v345_v60  ;;  %v346_v1 = vld [vmem:[#allocation5 + $0x150] sm:$0xff]  ;;  %v349_v2 = vld [vmem:[#allocation5 + $0x168] sm:$0xff]  ;;  %v351_v3 = vld [vmem:[#allocation5 + $0x178] sm:$0xff] }
  0x78   : > { %948 = vmatpush1.bf16.msra.mxu0 %v947_v25  ;;  %v975_v4 = vpack.c.bf16 %v346_v1, %v344_v0  ;;  %v977_v5 = vpack.c.bf16 %v351_v3, %v349_v2  ;;  %v348_v6 = vld [vmem:[#allocation5 + $0x160] sm:$0xff]  ;;  %v350_v7 = vld [vmem:[#allocation5 + $0x170] sm:$0xff]  ;;  %v353_v8 = vld [vmem:[#allocation5 + $0x188] sm:$0xff]  ;;  %v1311_v0 = vmov 0.0|0.0   ;;  %v1313_v1 = vmov 0.0  }
  0x79   : > { %950 = vmatprep.subr.bf16.mxu0 %v949_v26  ;;  %v355_v9 = vld [vmem:[#allocation5 + $0x198] sm:$0xff]  ;;  %v979_v10 = vpack.c.bf16 %v350_v7, %v348_v6  ;;  %v352_v12 = vld [vmem:[#allocation5 + $0x180] sm:$0xff]  ;;  %v354_v13 = vld [vmem:[#allocation5 + $0x190] sm:$0xff]  ;;  %997 = vmatprep.subr.bf16.mxu1 %v1311_v0  ;;  %v1314_v3 = vmov 0  }
  0x7a   : > { %v981_v11 = vpack.c.bf16 %v355_v9, %v353_v8  ;;  %v357_v14 = vld [vmem:[#allocation5 + $0x1a8] sm:$0xff]  ;;  %v359_v15 = vld [vmem:[#allocation5 + $0x1b8] sm:$0xff]  ;;  %v983_v16 = vpack.c.bf16 %v354_v13, %v352_v12  ;;  %v356_v18 = vld [vmem:[#allocation5 + $0x1a0] sm:$0xff]  ;;  %930 = vmatprep.mubr.msk.f32.mxu1 %vm1312_vm0, %v1313_v1  ;;  %1080 = vset.pattern.permute.xlu0 %v1314_v3 }
  0x7b   : > { %v985_v17 = vpack.c.bf16 %v359_v15, %v357_v14  ;;  %v358_v19 = vld [vmem:[#allocation5 + $0x1b0] sm:$0xff]  ;;  %v361_v20 = vld [vmem:[#allocation5 + $0x1c8] sm:$0xff]  ;;  %v363_v21 = vld [vmem:[#allocation5 + $0x1d8] sm:$0xff] }
  0x7c   : > { %952 = vmatpush1.bf16.msra.mxu0 %v951_v31  ;;  %v987_v22 = vpack.c.bf16 %v358_v19, %v356_v18  ;;  %v989_v23 = vpack.c.bf16 %v363_v21, %v361_v20  ;;  %v360_v24 = vld [vmem:[#allocation5 + $0x1c0] sm:$0xff]  ;;  %v362_v25 = vld [vmem:[#allocation5 + $0x1d0] sm:$0xff]  ;;  %v365_v26 = vld [vmem:[#allocation5 + $0x1e8] sm:$0xff] }
  0x7d   : > { %954 = vmatprep.subr.bf16.mxu0 %v953_v32  ;;  %v367_v27 = vld [vmem:[#allocation5 + $0x1f8] sm:$0xff]  ;;  %v991_v28 = vpack.c.bf16 %v362_v25, %v360_v24  ;;  %v364_v30 = vld [vmem:[#allocation5 + $0x1e0] sm:$0xff]  ;;  %v366_v31 = vld [vmem:[#allocation5 + $0x1f0] sm:$0xff] }
  0x7e   : > { %v993_v29 = vpack.c.bf16 %v367_v27, %v365_v26  ;;  %v995_v32 = vpack.c.bf16 %v366_v31, %v364_v30  ;;  %v272_v33 = vld [vmem:[%s1488_s9] sm:$0xff]  ;;  %v275_v34 = vld [vmem:[%s1488_s9 + $0x18] sm:$0xff]  ;;  %v274_v35 = vld [vmem:[%s1488_s9 + $0x10] sm:$0xff] }
  0x7f   : > { %v277_v36 = vld [vmem:[%s1488_s9 + $0x28] sm:$0xff]  ;;  %v278_v39 = vld [vmem:[%s1488_s9 + $0x30] sm:$0xff]  ;;  %v280_v41 = vld [vmem:[%s1488_s9 + $0x40] sm:$0xff] }
  0x80   : > { %956 = vmatpush1.bf16.msra.mxu0 %v955_v37  ;;  %v276_v37 = vld [vmem:[%s1488_s9 + $0x20] sm:$0xff]  ;;  %v281_v40 = vld [vmem:[%s1488_s9 + $0x48] sm:$0xff]  ;;  %v283_v42 = vld [vmem:[%s1488_s9 + $0x58] sm:$0xff] }
  0x81   : > { %958 = vmatprep.subr.bf16.mxu0 %v957_v38  ;;  %v279_v38 = vld [vmem:[%s1488_s9 + $0x38] sm:$0xff]  ;;  %v282_v43 = vld [vmem:[%s1488_s9 + $0x50] sm:$0xff]  ;;  %v289_v48 = vld [vmem:[%s1488_s9 + $0x88] sm:$0xff] }
  0x82   : > { %v287_v46 = vld [vmem:[%s1488_s9 + $0x78] sm:$0xff]  ;;  %v286_v47 = vld [vmem:[%s1488_s9 + $0x70] sm:$0xff]  ;;  %v288_v49 = vld [vmem:[%s1488_s9 + $0x80] sm:$0xff] }
  0x83   : > { %v293_v52 = vld [vmem:[%s1488_s9 + $0xa8] sm:$0xff]  ;;  %v292_v53 = vld [vmem:[%s1488_s9 + $0xa0] sm:$0xff]  ;;  %v295_v54 = vld [vmem:[%s1488_s9 + $0xb8] sm:$0xff] }
  0x84   : > { %960 = vmatpush1.bf16.msra.mxu0 %v959_v44  ;;  %v285_v44 = vld [vmem:[%s1488_s9 + $0x68] sm:$0xff]  ;;  %v294_v55 = vld [vmem:[%s1488_s9 + $0xb0] sm:$0xff]  ;;  %v299_v58 = vld [vmem:[%s1488_s9 + $0xd8] sm:$0xff] }
  0x85   : > { %962 = vmatprep.subr.bf16.mxu0 %v961_v45  ;;  %v284_v45 = vld [vmem:[%s1488_s9 + $0x60] sm:$0xff]  ;;  %v298_v59 = vld [vmem:[%s1488_s9 + $0xd0] sm:$0xff]  ;;  %v301_v60 = vld [vmem:[%s1488_s9 + $0xe8] sm:$0xff] }
  0x86   : > { %v300_v61 = vld [vmem:[%s1488_s9 + $0xe0] sm:$0xff] }
  0x87   : > { %v670_v2 = vld [vmem:[%s1636_s4] sm:$0xff] }
  0x88   : > { %964 = vmatpush1.bf16.msra.mxu0 %v963_v50  ;;  %v291_v50 = vld [vmem:[%s1488_s9 + $0x98] sm:$0xff]  ;;  %673 = vperm.xlu0 %1080, %v670_v2   ;;  %v368_v7 = vld [vmem:[%s1634_s2] sm:$0x3] }
  0x89   : > { %966 = vmatprep.subr.bf16.mxu0 %v965_v51  ;;  %v290_v51 = vld [vmem:[%s1488_s9 + $0x90] sm:$0xff] }
  0x8c   : > { %968 = vmatpush1.bf16.msra.mxu0 %v967_v56  ;;  %v297_v56 = vld [vmem:[%s1488_s9 + $0xc8] sm:$0xff] }
  0x8d   : > { %970 = vmatprep.subr.bf16.mxu0 %v969_v57  ;;  %v296_v57 = vld [vmem:[%s1488_s9 + $0xc0] sm:$0xff] }
  0x90   : > { %972 = vmatpush1.bf16.msra.mxu0 %v971_v62  ;;  %v303_v62 = vld [vmem:[%s1488_s9 + $0xf8] sm:$0xff] }
  0x91   : > { %974 = vmatprep.subr.bf16.mxu0 %v973_v63  ;;  %v302_v63 = vld [vmem:[%s1488_s9 + $0xf0] sm:$0xff]  ;;  %s1233_s9 = scalar_lea.vmem %s1590_s25, 128 }
  0x92   : > { %p1234_p9 = scmp.ne.s32.totalorder %s1590_s25, %s1233_s9  ;;  %p1241_p11 = scmp.lt.s32.totalorder %s1239_s7, %s1233_s9 }
  0x94   : > { %976 = vmatpush1.bf16.msra.mxu0 %v975_v4  ;;  %v370_v4 = vlaneseq  ;;  %p1235_p1 = pnand %p1234_p9, %p1653_p10  ;;  %p1242_p12 = por %p1241_p11, %p1240_p5 }
  0x95   : > { %978 = vmatprep.subr.bf16.mxu0 %v977_v5 }
  0x96   : > { %v371_v5 = vshrl.u32 %v370_v4, 7  ;;  %p1236_p4 = pneg %p1235_p1 }
  0x98   : > { %980 = vmatpush1.bf16.msra.mxu0 %v979_v10  ;;  %v376_v6 = vsub.s32 1, %v371_v5  ;;  %v372_v14 = vsub.s32 0, %v371_v5  ;;  %p1243_p2 = pnand %p1242_p12, %p1236_p4 }
  0x99   : > { %982 = vmatprep.subr.bf16.mxu0 %v981_v11 }
  0x9a   : > { %v1537_v8 = vrot.slane %v368_v7, %v376_v6  ;;  %v1541_v19 = vrot.slane %v368_v7, %v372_v14 }
  0x9c   : > { %984 = vmatpush1.bf16.msra.mxu0 %v983_v16 }
  0x9d   : > { %986 = vmatprep.subr.bf16.mxu0 %v985_v17 }
  0xa0   : > { %988 = vmatpush1.bf16.msra.mxu0 %v987_v22 }
  0xa1   : > { %990 = vmatprep.subr.bf16.mxu0 %v989_v23 }
  0xa4   : > { %992 = vmatpush1.bf16.msra.mxu0 %v991_v28 }
  0xa5   : > { %994 = vmatprep.subr.bf16.mxu0 %v993_v29 }
  0xa8   : > { %996 = vmatpush1.bf16.msra.mxu0 %v995_v32 }
  0xab   : > { %445 = vmatmul.mubr.f32.vlgmr.msra.gmra.mrb[0].mxu0 %v272_v33 }
  0xac   : > { %450 = vmatprep.mubr.f32.mxu0 %v275_v34 }
  0xaf   : > { %451 = vmatmul.mubr.f32.gmra.mrb[2].mxu0 %v274_v35 }
  0xb0   : > { %456 = vmatprep.mubr.f32.mxu0 %v277_v36 }
  0xb3   : > { %457 = vmatmul.mubr.f32.gmra.mrb[4].mxu0 %v276_v37 }
  0xb4   : > { %462 = vmatprep.mubr.f32.mxu0 %v279_v38 }
  0xb7   : > { %463 = vmatmul.mubr.f32.gmra.mrb[6].mxu0 %v278_v39 }
  0xb8   : > { %468 = vmatprep.mubr.f32.mxu0 %v281_v40 }
  0xbb   : > { %469 = vmatmul.mubr.f32.gmra.mrb[8].mxu0 %v280_v41 }
  0xbc   : > { %474 = vmatprep.mubr.f32.mxu0 %v283_v42 }
  0xbf   : > { %475 = vmatmul.mubr.f32.gmra.mrb[10].mxu0 %v282_v43 }
  0xc0   : > { %480 = vmatprep.mubr.f32.mxu0 %v285_v44 }
  0xc3   : > { %481 = vmatmul.mubr.f32.gmra.mrb[12].mxu0 %v284_v45 }
  0xc4   : > { %486 = vmatprep.mubr.f32.mxu0 %v287_v46 }
  0xc7   : > { %487 = vmatmul.mubr.f32.gmra.mrb[14].mxu0 %v286_v47 }
  0xc8   : > { %492 = vmatprep.mubr.f32.mxu0 %v289_v48 }
  0xcb   : > { %493 = vmatmul.mubr.f32.gmra.mrb[16].mxu0 %v288_v49 }
  0xcc   : > { %498 = vmatprep.mubr.f32.mxu0 %v291_v50 }
  0xcf   : > { %499 = vmatmul.mubr.f32.gmra.mrb[18].mxu0 %v290_v51 }
  0xd0   : > { %504 = vmatprep.mubr.f32.mxu0 %v293_v52 }
  0xd3   : > { %505 = vmatmul.mubr.f32.gmra.mrb[20].mxu0 %v292_v53 }
  0xd4   : > { %510 = vmatprep.mubr.f32.mxu0 %v295_v54 }
  0xd7   : > { %511 = vmatmul.mubr.f32.gmra.mrb[22].mxu0 %v294_v55 }
  0xd8   : > { %516 = vmatprep.mubr.f32.mxu0 %v297_v56 }
  0xdb   : > { %517 = vmatmul.mubr.f32.gmra.mrb[24].mxu0 %v296_v57 }
  0xdc   : > { %522 = vmatprep.mubr.f32.mxu0 %v299_v58 }
  0xdf   : > { %523 = vmatmul.mubr.f32.gmra.mrb[26].mxu0 %v298_v59 }
  0xe0   : > { %528 = vmatprep.mubr.f32.mxu0 %v301_v60 }
  0xe3   : > { %529 = vmatmul.mubr.f32.gmra.mrb[28].mxu0 %v300_v61 }
  0xe4   : > { %534 = vmatprep.mubr.f32.mxu0 %v303_v62 }
  0xe7   : > { %535 = vmatmul.mubr.f32.gmra.mrb[30].mxu0 %v302_v63 }
 0x17e   : > { %v446_v9 = vpop.f32.mrb[0].mxu0 }
 0x17f   : > { %v448_v10 = vpop.f32.mrb[1].mxu0  ;;  %v447_v24 = vadd.f32 %v446_v9, %v1541_v19 }
 0x180   : > { %v449_v11 = vadd.f32 %v448_v10, %v1537_v8 }
 0x182   : > { %v858_v12 = vmul.f32 -1.442695, %v449_v11  ;;  %v452_v13 = vpop.f32.mrb[2].mxu0 }
 0x183   : > { %v454_v15 = vpop.f32.mrb[3].mxu0  ;;  %v453_v31 = vadd.f32 %v452_v13, %v1541_v19 }
 0x184   : > { %1081 = vpow2.f32 %v858_v12  ;;  %v455_v16 = vadd.f32 %v454_v15, %v1537_v8 }
 0x186   : > { %v859_v17 = vmul.f32 -1.442695, %v455_v16  ;;  %v458_v18 = vpop.f32.mrb[4].mxu0 }
 0x187   : > { %v460_v20 = vpop.f32.mrb[5].mxu0  ;;  %v459_v38 = vadd.f32 %v458_v18, %v1541_v19 }
 0x188   : > { %1083 = vpow2.f32 %v859_v17  ;;  %v461_v21 = vadd.f32 %v460_v20, %v1537_v8 }
 0x18a   : > { %v860_v22 = vmul.f32 -1.442695, %v461_v21  ;;  %v464_v23 = vpop.f32.mrb[6].mxu0 }
 0x18b   : > { %v466_v25 = vpop.f32.mrb[7].mxu0  ;;  %v465_v45 = vadd.f32 %v464_v23, %v1541_v19 }
 0x18c   : > { %1085 = vpow2.f32 %v860_v22  ;;  %v467_v26 = vadd.f32 %v466_v25, %v1537_v8 }
 0x18d   : > { %1087 = vtanh.f32 %v447_v24 }
 0x18e   : > { %v1082_v27 = vpop.eup %1081  ;;  %v861_v28 = vmul.f32 -1.442695, %v467_v26  ;;  %v470_v29 = vpop.f32.mrb[8].mxu0 }
 0x18f   : > { %v605_v30 = vadd.f32 1.0, %v1082_v27  ;;  %v472_v32 = vpop.f32.mrb[9].mxu0  ;;  %v471_v54 = vadd.f32 %v470_v29, %v1541_v19 }
 0x190   : > { %1089 = vpow2.f32 %v861_v28  ;;  %v473_v33 = vadd.f32 %v472_v32, %v1537_v8 }
 0x191   : > { %1091 = vrcp.f32 %v605_v30 }
 0x192   : > { %v1084_v34 = vpop.eup %1083  ;;  %v862_v35 = vmul.f32 -1.442695, %v473_v33  ;;  %v476_v36 = vpop.f32.mrb[10].mxu0  ;;  %1093 = vtanh.f32 %v453_v31 }
 0x193   : > { %v606_v37 = vadd.f32 1.0, %v1084_v34  ;;  %v478_v39 = vpop.f32.mrb[11].mxu0  ;;  %v477_v1 = vadd.f32 %v476_v36, %v1541_v19 }
 0x194   : > { %1095 = vpow2.f32 %v862_v35  ;;  %v479_v40 = vadd.f32 %v478_v39, %v1537_v8 }
 0x195   : > { %1097 = vrcp.f32 %v606_v37 }
 0x196   : > { %v1086_v41 = vpop.eup %1085  ;;  %v863_v42 = vmul.f32 -1.442695, %v479_v40  ;;  %v482_v43 = vpop.f32.mrb[12].mxu0  ;;  %1099 = vtanh.f32 %v459_v38 }
 0x197   : > { %v607_v44 = vadd.f32 1.0, %v1086_v41  ;;  %v484_v46 = vpop.f32.mrb[13].mxu0  ;;  %v1088_v48 = vpop.eup %1087  ;;  %v483_v13 = vadd.f32 %v482_v43, %v1541_v19 }
 0x198   : > { %1101 = vpow2.f32 %v863_v42  ;;  %v485_v47 = vadd.f32 %v484_v46, %v1537_v8 }
 0x199   : > { %1103 = vrcp.f32 %v607_v44 }
 0x19a   : > { %v1090_v49 = vpop.eup %1089  ;;  %v864_v50 = vmul.f32 -1.442695, %v485_v47  ;;  %v488_v51 = vpop.f32.mrb[14].mxu0  ;;  %1105 = vtanh.f32 %v465_v45 }
 0x19b   : > { %v1092_v52 = vpop.eup %1091  ;;  %v608_v53 = vadd.f32 1.0, %v1090_v49  ;;  %v490_v55 = vpop.f32.mrb[15].mxu0  ;;  %v489_v24 = vadd.f32 %v488_v51, %v1541_v19 }
 0x19c   : > { %1107 = vpow2.f32 %v864_v50  ;;  %v491_v56 = vadd.f32 %v490_v55, %v1537_v8  ;;  %v653_v57 = vmul.f32 %v1092_v52, %v1088_v48  ;;  %v1094_v58 = vpop.eup %1093 }
 0x19d   : > { %1109 = vrcp.f32 %v608_v53 }
 0x19e   : > { %v1096_v59 = vpop.eup %1095  ;;  %v865_v60 = vmul.f32 -1.442695, %v491_v56  ;;  %v494_v61 = vpop.f32.mrb[16].mxu0  ;;  %1111 = vtanh.f32 %v471_v54 }
 0x19f   : > { %v1098_v62 = vpop.eup %1097  ;;  %v609_v63 = vadd.f32 1.0, %v1096_v59  ;;  %v496_v2 = vpop.f32.mrb[17].mxu0  ;;  %v495_v35 = vadd.f32 %v494_v61, %v1541_v19 }
 0x1a0   : > { %1113 = vpow2.f32 %v865_v60  ;;  %v497_v3 = vadd.f32 %v496_v2, %v1537_v8  ;;  %v654_v4 = vmul.f32 %v1098_v62, %v1094_v58  ;;  %v1100_v5 = vpop.eup %1099 }
 0x1a1   : > { %1115 = vrcp.f32 %v609_v63 }
 0x1a2   : > { %v1102_v6 = vpop.eup %1101  ;;  %v866_v7 = vmul.f32 -1.442695, %v497_v3  ;;  %v500_v9 = vpop.f32.mrb[18].mxu0  ;;  %v998_v10 = vpack.c.bf16 %v654_v4, %v653_v57  ;;  %1117 = vtanh.f32 %v477_v1 }
 0x1a3   : > { %v1104_v11 = vpop.eup %1103  ;;  %v610_v12 = vadd.f32 1.0, %v1102_v6  ;;  %v502_v14 = vpop.f32.mrb[19].mxu0  ;;  %v501_v45 = vadd.f32 %v500_v9, %v1541_v19 }
 0x1a4   : > { %1119 = vpow2.f32 %v866_v7  ;;  %v503_v15 = vadd.f32 %v502_v14, %v1537_v8  ;;  %999 = vmatpush3.bf16.xpose.msra.mxu1 %v998_v10  ;;  %v655_v16 = vmul.f32 %v1104_v11, %v1100_v5  ;;  %v1106_v17 = vpop.eup %1105 }
 0x1a5   : > { %1121 = vrcp.f32 %v610_v12  ;;  %1000 = vmatprep.subr.bf16.mxu1 %v1311_v0 }
 0x1a6   : > { %v1108_v18 = vpop.eup %1107  ;;  %v867_v20 = vmul.f32 -1.442695, %v503_v15  ;;  %v506_v21 = vpop.f32.mrb[20].mxu0  ;;  %1123 = vtanh.f32 %v483_v13 }
 0x1a7   : > { %v1110_v22 = vpop.eup %1109  ;;  %v611_v23 = vadd.f32 1.0, %v1108_v18  ;;  %v508_v25 = vpop.f32.mrb[21].mxu0  ;;  %v507_v56 = vadd.f32 %v506_v21, %v1541_v19 }
 0x1a8   : > { %1125 = vpow2.f32 %v867_v20  ;;  %v509_v26 = vadd.f32 %v508_v25, %v1537_v8  ;;  %v656_v27 = vmul.f32 %v1110_v22, %v1106_v17  ;;  %v1112_v28 = vpop.eup %1111 }
 0x1a9   : > { %1127 = vrcp.f32 %v611_v23 }
 0x1aa   : > { %v1114_v29 = vpop.eup %1113  ;;  %v868_v30 = vmul.f32 -1.442695, %v509_v26  ;;  %v512_v31 = vpop.f32.mrb[22].mxu0  ;;  %v1001_v32 = vpack.c.bf16 %v656_v27, %v655_v16  ;;  %1129 = vtanh.f32 %v489_v24 }
 0x1ab   : > { %v1116_v33 = vpop.eup %1115  ;;  %v612_v34 = vadd.f32 1.0, %v1114_v29  ;;  %v514_v36 = vpop.f32.mrb[23].mxu0  ;;  %v513_v3 = vadd.f32 %v512_v31, %v1541_v19 }
 0x1ac   : > { %1131 = vpow2.f32 %v868_v30  ;;  %v515_v37 = vadd.f32 %v514_v36, %v1537_v8  ;;  %1002 = vmatpush3.bf16.xpose.msra.mxu1 %v1001_v32  ;;  %v657_v38 = vmul.f32 %v1116_v33, %v1112_v28  ;;  %v1118_v39 = vpop.eup %1117 }
 0x1ad   : > { %1133 = vrcp.f32 %v612_v34  ;;  %1003 = vmatprep.subr.bf16.mxu1 %v1311_v0 }
 0x1ae   : > { %v1120_v40 = vpop.eup %1119  ;;  %v869_v41 = vmul.f32 -1.442695, %v515_v37  ;;  %v518_v42 = vpop.f32.mrb[24].mxu0  ;;  %1135 = vtanh.f32 %v495_v35 }
 0x1af   : > { %v1122_v43 = vpop.eup %1121  ;;  %v613_v44 = vadd.f32 1.0, %v1120_v40  ;;  %v520_v46 = vpop.f32.mrb[25].mxu0  ;;  %v519_v15 = vadd.f32 %v518_v42, %v1541_v19 }
 0x1b0   : > { %1137 = vpow2.f32 %v869_v41  ;;  %v521_v47 = vadd.f32 %v520_v46, %v1537_v8  ;;  %v658_v48 = vmul.f32 %v1122_v43, %v1118_v39  ;;  %v1124_v49 = vpop.eup %1123 }
 0x1b1   : > { %1139 = vrcp.f32 %v613_v44 }
 0x1b2   : > { %v1126_v50 = vpop.eup %1125  ;;  %v870_v51 = vmul.f32 -1.442695, %v521_v47  ;;  %v524_v52 = vpop.f32.mrb[26].mxu0  ;;  %v1004_v53 = vpack.c.bf16 %v658_v48, %v657_v38  ;;  %1141 = vtanh.f32 %v501_v45 }
 0x1b3   : > { %v1128_v54 = vpop.eup %1127  ;;  %v614_v55 = vadd.f32 1.0, %v1126_v50  ;;  %v526_v57 = vpop.f32.mrb[27].mxu0  ;;  %v525_v25 = vadd.f32 %v524_v52, %v1541_v19 }
 0x1b4   : > { %1143 = vpow2.f32 %v870_v51  ;;  %v527_v58 = vadd.f32 %v526_v57, %v1537_v8  ;;  %1005 = vmatpush3.bf16.xpose.msra.mxu1 %v1004_v53  ;;  %v659_v59 = vmul.f32 %v1128_v54, %v1124_v49  ;;  %v1130_v60 = vpop.eup %1129 }
 0x1b5   : > { %1145 = vrcp.f32 %v614_v55  ;;  %1006 = vmatprep.subr.bf16.mxu1 %v1311_v0  ;;  %v669_v55 = vld [vmem:[%s1635_s3] sm:$0xff] }
 0x1b6   : > { %v1132_v61 = vpop.eup %1131  ;;  %v871_v62 = vmul.f32 -1.442695, %v527_v58  ;;  %v530_v63 = vpop.f32.mrb[28].mxu0  ;;  %1147 = vtanh.f32 %v507_v56 }
 0x1b7   : > { %v1134_v1 = vpop.eup %1133  ;;  %v615_v2 = vadd.f32 1.0, %v1132_v61  ;;  %v532_v4 = vpop.f32.mrb[29].mxu0  ;;  %v531_v31 = vadd.f32 %v530_v63, %v1541_v19 }
 0x1b8   : > { %1149 = vpow2.f32 %v871_v62  ;;  %v533_v5 = vadd.f32 %v532_v4, %v1537_v8  ;;  %v660_v6 = vmul.f32 %v1134_v1, %v1130_v60  ;;  %v1136_v7 = vpop.eup %1135  ;;  %v674_v56 = vpop.permute.xlu0 %673 }
 0x1b9   : > { %1151 = vrcp.f32 %v615_v2 }
 0x1ba   : > { %v1138_v9 = vpop.eup %1137  ;;  %v872_v10 = vmul.f32 -1.442695, %v533_v5  ;;  %v536_v11 = vpop.f32.mrb[30].mxu0  ;;  %v1007_v12 = vpack.c.bf16 %v660_v6, %v659_v59  ;;  %1153 = vtanh.f32 %v513_v3 }
 0x1bb   : > { %v1140_v13 = vpop.eup %1139  ;;  %v616_v14 = vadd.f32 1.0, %v1138_v9  ;;  %v538_v16 = vpop.f32.mrb[31].mxu0  ;;  %v537_v37 = vadd.f32 %v536_v11, %v1541_v19 }
 0x1bc   : > { %1155 = vpow2.f32 %v872_v10  ;;  %v539_v17 = vadd.f32 %v538_v16, %v1537_v8  ;;  %1008 = vmatpush3.bf16.xpose.msra.mxu1 %v1007_v12  ;;  %v661_v18 = vmul.f32 %v1140_v13, %v1136_v7  ;;  %v1142_v20 = vpop.eup %1141 }
 0x1bd   : > { %1157 = vrcp.f32 %v616_v14  ;;  %1009 = vmatprep.subr.bf16.mxu1 %v1311_v0 }
 0x1be   : > { %v1144_v21 = vpop.eup %1143  ;;  %v873_v22 = vmul.f32 -1.442695, %v539_v17  ;;  %1159 = vtanh.f32 %v519_v15 }
 0x1bf   : > { %v1146_v23 = vpop.eup %1145  ;;  %v617_v24 = vadd.f32 1.0, %v1144_v21 }
 0x1c0   : > { %1161 = vpow2.f32 %v873_v22  ;;  %v662_v26 = vmul.f32 %v1146_v23, %v1142_v20  ;;  %v1148_v27 = vpop.eup %1147 }
 0x1c1   : > { %1163 = vrcp.f32 %v617_v24 }
 0x1c2   : > { %v1150_v28 = vpop.eup %1149  ;;  %v1010_v29 = vpack.c.bf16 %v662_v26, %v661_v18  ;;  %1165 = vtanh.f32 %v525_v25 }
 0x1c3   : > { %v1152_v8 = vpop.eup %1151  ;;  %v618_v30 = vadd.f32 1.0, %v1150_v28 }
 0x1c4   : > { %1011 = vmatpush3.bf16.xpose.msra.mxu1 %v1010_v29  ;;  %v663_v32 = vmul.f32 %v1152_v8, %v1148_v27  ;;  %v1154_v33 = vpop.eup %1153 }
 0x1c5   : > { %1167 = vrcp.f32 %v618_v30  ;;  %1012 = vmatprep.subr.bf16.mxu1 %v1311_v0 }
 0x1c6   : > { %v1156_v34 = vpop.eup %1155  ;;  %1169 = vtanh.f32 %v531_v31 }
 0x1c7   : > { %v1158_v35 = vpop.eup %1157  ;;  %v619_v36 = vadd.f32 1.0, %v1156_v34 }
 0x1c8   : > { %v664_v38 = vmul.f32 %v1158_v35, %v1154_v33  ;;  %v1160_v39 = vpop.eup %1159 }
 0x1c9   : > { %1171 = vrcp.f32 %v619_v36 }
 0x1ca   : > { %v1162_v40 = vpop.eup %1161  ;;  %v1013_v41 = vpack.c.bf16 %v664_v38, %v663_v32  ;;  %1173 = vtanh.f32 %v537_v37 }
 0x1cb   : > { %v1164_v42 = vpop.eup %1163  ;;  %v620_v43 = vadd.f32 1.0, %v1162_v40 }
 0x1cc   : > { %1014 = vmatpush3.bf16.xpose.msra.mxu1 %v1013_v41  ;;  %v665_v44 = vmul.f32 %v1164_v42, %v1160_v39  ;;  %v1166_v45 = vpop.eup %1165 }
 0x1cd   : > { %1175 = vrcp.f32 %v620_v43  ;;  %1015 = vmatprep.subr.bf16.mxu1 %v1311_v0 }
 0x1cf   : > { %v1168_v46 = vpop.eup %1167 }
 0x1d0   : > { %v666_v47 = vmul.f32 %v1168_v46, %v1166_v45  ;;  %v1170_v48 = vpop.eup %1169 }
 0x1d2   : > { %v1016_v19 = vpack.c.bf16 %v666_v47, %v665_v44 }
 0x1d3   : > { %v1172_v49 = vpop.eup %1171 }
 0x1d4   : > { %1017 = vmatpush3.bf16.xpose.msra.mxu1 %v1016_v19  ;;  %v667_v50 = vmul.f32 %v1172_v49, %v1170_v48  ;;  %v1174_v51 = vpop.eup %1173 }
 0x1d5   : > { %1018 = vmatprep.subr.bf16.mxu1 %v1311_v0 }
 0x1d7   : > { %v1176_v52 = vpop.eup %1175 }
 0x1d8   : > { %v668_v53 = vmul.f32 %v1176_v52, %v1174_v51 }
 0x1da   : > { %v1019_v54 = vpack.c.bf16 %v668_v53, %v667_v50 }
 0x1dc   : > { %1020 = vmatpush3.bf16.xpose.msra.mxu1 %v1019_v54 }
 0x1e3   : > { %931 = vmatmul.mubr.f32.vlgmr.msra.gmra.mrb[0].mxu1 %v669_v55 }
 0x2b6   : > { %v742_v57 = vpop.f32.mrb[0].mxu1 }
 0x2b7   : > { %v743_v58 = vadd.f32 %v742_v57, %v674_v56  ;;  %v932_v0 = vpop.f32.mrb[1].mxu1 }
 0x2b9   : > { %746 = vst [vmem:[%s265_s23] sm:$0xff] %v743_v58 }
 0x2ba   : > { %1246 = shalt.err (!%p1243_p2)
}
 0x2bb   : > { %s1247_s13 = scalar_lea.hbm %s1588_s14, 128  ;;  %s1251_s26 = scalar_lea.hbm %s1637_s5, 256 }
 0x2bc   : > { %p1248_p3 = scmp.ne.s32.totalorder %s1588_s14, %s1247_s13  ;;  %p1252_p6 = scmp.lt.u32.totalorder %s1588_s14, %s1637_s5 }
 0x2bd   : > { %p1253_p8 = scmp.lt.u32.totalorder %s1251_s26, %s1247_s13  ;;  %p1255_p1 = scmp.lt.u32.totalorder %s1247_s13, %s1588_s14 }
 0x2be   : > { %p1249_p13 = pnand %p1248_p3, %p1653_p10 }
 0x2bf   : > { %p1254_p9 = por %p1253_p8, %p1252_p6 }
 0x2c0   : > { %p1250_p7 = pneg %p1249_p13 }
 0x2c1   : > { %p1256_p4 = por %p1255_p1, %p1254_p9 }
 0x2c3   : > { %p1257_p5 = pnand %p1256_p4, %p1250_p7 }
 0x2c5   : > { %1260 = shalt.err (!%p1257_p5)
}
 0x2c6   : > { %1026 = dma.vmem_to_hbm [thread:$0]  (%p1653_p10), %s1590_s25, 128, %s1588_s14, %s748_s15  }
 0x2c7 PF: > { %s773_s28 = sand.u32 1, %s1291_s18   ;;  %p1654_p11 = scmp.ne.s32.totalorder %s1645_s6, 0 }
 0x2c8   : > { %s774_s23 = scalar_lea.sflag [#allocation4], %s773_s28 }
 0x2c9   : > { %p1033_p12 = pnand %p844_p0, %p1654_p11 }
 0x2cb   : > { %1286 = dma.done.wait (!%p1033_p12), %s774_s23, 128  }
 0x2cc   : > { %1288 = vsyncadd (!%p1033_p12), %s774_s23, 4294967168  ;;  %p19_p2 = scmp.ge.s32.totalorder %s1371_s24, 4   ;;  %s1655_s18 = smov %s1295_s19 }
 0x2cd   : > { %s1656_s19 = smov %s1299_s20  ;;  %s1657_s20 = smov %s1383_s27 }
 0x2ce   : > { %s1658_s21 = smov %s1371_s24  ;;  %21 = sbr.rel (!%p19_p2) target bundleno = 6 (0x6), region = 89 }
 0x2d5   :  { %779 = vsyncpa [#allocation3], 1 }
 0x2d6   :  { %781 = vsyncpa [#allocation3 + $0x1], 1 }
 0x2d7   :  { %782 = vsyncpa [#allocation6], 1 }
 0x2d8   :  { %783 = vsyncpa [#allocation4], 1 }
 0x2d9   :  { %785 = vsyncpa [#allocation4 + $0x1], 1 }

</bundles_post_ra>
